<compile_context>
chip_gen: v6e
topology: v6e:2x2x1
jax: 0.10.0
libtpu: 0.0.40
codegen_flags: <defaults>
</compile_context>

<pallas_src>
import jax
import jax.numpy as jnp
from jax.experimental import pallas as pl
from jax.experimental.pallas import tpu as pltpu


def _round_up(x, m):
    return (x + m - 1) // m * m


def _cdiv(a, b):
    return (a + b - 1) // b


def _make_kernel(return_encoded):
    def kernel(x_ref, we_ref, be_ref, wd_ref, bd_ref, *out_refs):
        if return_encoded:
            enc_ref, dec_ref = out_refs
        else:
            (dec_ref,) = out_refs
            enc_ref = None

        # Encoder: sigmoid(x @ W_enc + b_enc).  bf16 MXU operands, f32 acc.
        x = x_ref[...].astype(jnp.bfloat16)                       # cast in VMEM
        z = jnp.dot(x, we_ref[...], preferred_element_type=jnp.float32)
        z = z + be_ref[...]                                       # (TB,L) + (1,L)
        enc = 0.5 * jnp.tanh(0.5 * z) + 0.5                       # 1 EUP op sigmoid
        if enc_ref is not None:
            enc_ref[...] = enc.astype(enc_ref.dtype)

        # Decoder: sigmoid(encoded @ W_dec + b_dec).  Reuses in-register f32 enc.
        y = jnp.dot(enc.astype(jnp.bfloat16), wd_ref[...],
                    preferred_element_type=jnp.float32)
        y = y + bd_ref[...]                                       # (TB,O) + (1,O)
        dec_ref[...] = (0.5 * jnp.tanh(0.5 * y) + 0.5).astype(dec_ref.dtype)

    return kernel


def autoencoder_forward(x, w_enc, b_enc, w_dec, b_dec, *,
                        block_b=1024, out_dtype=None, return_encoded=True):
    """Forward pass of AutoEncoderSimple.

    x: (B, D_in); w_enc: (D_in, L); b_enc: (L,); w_dec: (L, O); b_dec: (O,).
    Returns (encoded, decoded) if return_encoded else decoded.
    """
    B, D_in = x.shape
    L = w_enc.shape[1]
    O = w_dec.shape[1]
    out_dtype = jnp.dtype(x.dtype if out_dtype is None else out_dtype)

    # --- Batch tile selection (no padding of x in HBM) ---------------------
    if B <= block_b:
        TB = B                                   # single full-batch block
    elif B <= 2 * block_b:
        TB = _round_up(_cdiv(B, 2), 16)          # >=2 steps: keep both v7x TCs busy
    else:
        TB = block_b
    n_tiles = _cdiv(B, TB)                       # trailing partial block is masked

    # --- Small, resident operands (weights bf16 for MXU, biases f32) -------
    we = w_enc.astype(jnp.bfloat16)
    wd = w_dec.astype(jnp.bfloat16)
    be = b_enc.astype(jnp.float32).reshape(1, L)
    bd = b_dec.astype(jnp.float32).reshape(1, O)

    in_specs = [
        pl.BlockSpec((TB, D_in), lambda i: (i, 0)),   # x: tiled over batch only
        pl.BlockSpec((D_in, L), lambda i: (0, 0)),    # W_enc: resident
        pl.BlockSpec((1, L), lambda i: (0, 0)),       # b_enc: resident
        pl.BlockSpec((L, O), lambda i: (0, 0)),       # W_dec: resident
        pl.BlockSpec((1, O), lambda i: (0, 0)),       # b_dec: resident
    ]
    if return_encoded:
        out_shape = (jax.ShapeDtypeStruct((B, L), out_dtype),
                     jax.ShapeDtypeStruct((B, O), out_dtype))
        out_specs = (pl.BlockSpec((TB, L), lambda i: (i, 0)),
                     pl.BlockSpec((TB, O), lambda i: (i, 0)))
    else:
        out_shape = jax.ShapeDtypeStruct((B, O), out_dtype)
        out_specs = pl.BlockSpec((TB, O), lambda i: (i, 0))

    # --- VMEM budget (double-buffered x / outputs, resident weights) -------
    x_item = jnp.dtype(x.dtype).itemsize
    o_item = out_dtype.itemsize
    n_out = 2 if return_encoded else 1
    vmem_bytes = (
        2 * TB * D_in * x_item                              # x tile, double-buffered
        + 2 * TB * L * o_item * (1 if return_encoded else 0)
        + 2 * TB * O * o_item                               # out tiles, double-buffered
        + 2 * (D_in * L + L * O) * 2 + 2 * (L + O) * 4      # weights/biases (2 bufs)
        + TB * (2 * D_in + 4 * L + 4 * O + 2 * L + 2 * O)   # in-kernel intermediates
    )
    vmem_limit = int(min(48 * 1024 * 1024, max(8 * 1024 * 1024, 2 * vmem_bytes)))

    flops = 2 * B * (D_in * L + L * O)
    transcendentals = B * (L + O)                            # one tanh per element
    bytes_accessed = (B * D_in * x_item
                      + (D_in * L + L * O) * 2 + (L + O) * 4
                      + (B * L * o_item if return_encoded else 0)
                      + B * O * o_item)

    result = pl.pallas_call(
        _make_kernel(return_encoded),
        out_shape=out_shape,
        grid=(n_tiles,),
        in_specs=in_specs,
        out_specs=out_specs,
        compiler_params=pltpu.CompilerParams(
            dimension_semantics=("parallel",),
            vmem_limit_bytes=vmem_limit,
        ),
        cost_estimate=pl.CostEstimate(
            flops=flops,
            transcendentals=transcendentals,
            bytes_accessed=bytes_accessed,
        ),
    )(x, we, be, wd, bd)

    if return_encoded:
        encoded, decoded = result
        return encoded, decoded
    return result


def init_params(key, input_dim, latent_dim, output_dim, dtype=jnp.float32):
    """Deterministic init mimicking nn.Linear's uniform(-1/sqrt(fan_in), 1/sqrt(fan_in))."""
    k1, k2, k3, k4 = jax.random.split(key, 4)
    lim_e = 1.0 / jnp.sqrt(input_dim)
    lim_d = 1.0 / jnp.sqrt(latent_dim)
    w_enc = jax.random.uniform(k1, (input_dim, latent_dim), dtype, -lim_e, lim_e)
    b_enc = jax.random.uniform(k2, (latent_dim,), dtype, -lim_e, lim_e)
    w_dec = jax.random.uniform(k3, (latent_dim, output_dim), dtype, -lim_d, lim_d)
    b_dec = jax.random.uniform(k4, (output_dim,), dtype, -lim_d, lim_d)
    return w_enc, b_enc, w_dec, b_dec


if __name__ == "__main__":
    key = jax.random.PRNGKey(0)
    kx, kp = jax.random.split(key)

    batch = 200
    input_dim = 32
    latent_dim = 16
    output_dim = 32

    x = jax.random.normal(kx, (batch, input_dim), jnp.float32)
    w_enc, b_enc, w_dec, b_dec = init_params(kp, input_dim, latent_dim, output_dim)

    # Pure-JAX f32 reference (kernel uses bf16 matmul operands, so allow
    # a loose-but-meaningful tolerance).
    enc_ref = jax.nn.sigmoid(x @ w_enc + b_enc)
    dec_ref = jax.nn.sigmoid(enc_ref @ w_dec + b_dec)

    # 1) Default path: single full-batch tile (TB == B), no padding anywhere.
    enc, dec = autoencoder_forward(x, w_enc, b_enc, w_dec, b_dec)
    jax.block_until_ready((enc, dec))
    assert enc.shape == (batch, latent_dim) and dec.shape == (batch, output_dim)
    assert jnp.allclose(enc, enc_ref, atol=2e-2), "encoded mismatch (default path)"
    assert jnp.allclose(dec, dec_ref, atol=2e-2), "decoded mismatch (default path)"

    # 2) Multi-step batch grid with a partial trailing block (200 over TB=64).
    enc2, dec2 = autoencoder_forward(x, w_enc, b_enc, w_dec, b_dec, block_b=64)
    jax.block_until_ready((enc2, dec2))
    assert jnp.allclose(enc2, enc_ref, atol=2e-2), "encoded mismatch (tiled path)"
    assert jnp.allclose(dec2, dec_ref, atol=2e-2), "decoded mismatch (tiled path)"

    # 3) decoded-only path (encoded HBM writeback elided).
    dec3 = autoencoder_forward(x, w_enc, b_enc, w_dec, b_dec, return_encoded=False)
    jax.block_until_ready(dec3)
    assert jnp.allclose(dec3, dec_ref, atol=2e-2), "decoded mismatch (decode-only path)"

    print("KERNEL_OK")
</pallas_src>

<mosaic_0001>
module attributes {stable_mosaic.version = 11 : i64} {
  func.func @kernel(%arg0: i32, %arg1: memref<200x32xf32, #tpu.memory_space<vmem>>, %arg2: memref<32x16xbf16, #tpu.memory_space<vmem>>, %arg3: memref<1x16xf32, #tpu.memory_space<vmem>>, %arg4: memref<16x32xbf16, #tpu.memory_space<vmem>>, %arg5: memref<1x32xf32, #tpu.memory_space<vmem>>, %arg6: memref<200x16xf32, #tpu.memory_space<vmem>>, %arg7: memref<200x32xf32, #tpu.memory_space<vmem>>) attributes {dimension_semantics = [#tpu.dimension_semantics<parallel>], iteration_bounds = array<i64: 1>, scalar_prefetch = 0 : i64, scratch_operands = 0 : i64, tpu.core_type = #tpu.core_type<tc>, window_params = [{transform_indices = @transform_0, window_bounds = array<i64: 200, 32>}, {pipeline_mode = #tpu.pipeline_mode<synchronous>, transform_indices = @transform_1, window_bounds = array<i64: 32, 16>}, {pipeline_mode = #tpu.pipeline_mode<synchronous>, transform_indices = @transform_2, window_bounds = array<i64: 1, 16>}, {pipeline_mode = #tpu.pipeline_mode<synchronous>, transform_indices = @transform_3, window_bounds = array<i64: 16, 32>}, {pipeline_mode = #tpu.pipeline_mode<synchronous>, transform_indices = @transform_4, window_bounds = array<i64: 1, 32>}, {transform_indices = @transform_5, window_bounds = array<i64: 200, 16>}, {transform_indices = @transform_6, window_bounds = array<i64: 200, 32>}]} {
    %c0 = arith.constant 0 : index
    %c0_0 = arith.constant 0 : index
    %0 = vector.load %arg1[%c0, %c0_0] : memref<200x32xf32, #tpu.memory_space<vmem>>, vector<200x32xf32>
    %1 = arith.truncf %0 : vector<200x32xf32> to vector<200x32xbf16>
    %c0_1 = arith.constant 0 : index
    %c0_2 = arith.constant 0 : index
    %2 = vector.load %arg2[%c0_1, %c0_2] : memref<32x16xbf16, #tpu.memory_space<vmem>>, vector<32x16xbf16>
    %cst = arith.constant dense<0.000000e+00> : vector<200x16xf32>
    %3 = tpu.matmul %1, %2, %cst {dimension_numbers = #tpu.dot_dimension_numbers<[1], [0], [0], [1], [0, 0, 1, 1], [], []>} : vector<200x32xbf16>, vector<32x16xbf16>, vector<200x16xf32> -> vector<200x16xf32>
    %c0_3 = arith.constant 0 : index
    %c0_4 = arith.constant 0 : index
    %4 = vector.load %arg3[%c0_3, %c0_4] : memref<1x16xf32, #tpu.memory_space<vmem>>, vector<1x16xf32>
    %5 = vector.broadcast %4 : vector<1x16xf32> to vector<200x16xf32>
    %6 = arith.addf %3, %5 : vector<200x16xf32>
    %cst_5 = arith.constant 5.000000e-01 : f32
    %7 = vector.broadcast %cst_5 : f32 to vector<200x16xf32>
    %8 = arith.mulf %7, %6 : vector<200x16xf32>
    %9 = math.tanh %8 : vector<200x16xf32>
    %cst_6 = arith.constant 5.000000e-01 : f32
    %10 = vector.broadcast %cst_6 : f32 to vector<200x16xf32>
    %11 = arith.mulf %10, %9 : vector<200x16xf32>
    %cst_7 = arith.constant 5.000000e-01 : f32
    %12 = vector.broadcast %cst_7 : f32 to vector<200x16xf32>
    %13 = arith.addf %11, %12 : vector<200x16xf32>
    %c0_8 = arith.constant 0 : index
    %c0_9 = arith.constant 0 : index
    %14 = vector.load %arg6[%c0_8, %c0_9] : memref<200x16xf32, #tpu.memory_space<vmem>>, vector<200x16xf32>
    tpu.vector_store %arg6[%c0_8, %c0_9], %13 {strides = array<i32>} : memref<200x16xf32, #tpu.memory_space<vmem>>, vector<200x16xf32>,
    %15 = arith.truncf %13 : vector<200x16xf32> to vector<200x16xbf16>
    %c0_10 = arith.constant 0 : index
    %c0_11 = arith.constant 0 : index
    %16 = vector.load %arg4[%c0_10, %c0_11] : memref<16x32xbf16, #tpu.memory_space<vmem>>, vector<16x32xbf16>
    %cst_12 = arith.constant dense<0.000000e+00> : vector<200x32xf32>
    %17 = tpu.matmul %15, %16, %cst_12 {dimension_numbers = #tpu.dot_dimension_numbers<[1], [0], [0], [1], [0, 0, 1, 1], [], []>} : vector<200x16xbf16>, vector<16x32xbf16>, vector<200x32xf32> -> vector<200x32xf32>
    %c0_13 = arith.constant 0 : index
    %c0_14 = arith.constant 0 : index
    %18 = vector.load %arg5[%c0_13, %c0_14] : memref<1x32xf32, #tpu.memory_space<vmem>>, vector<1x32xf32>
    %19 = vector.broadcast %18 : vector<1x32xf32> to vector<200x32xf32>
    %20 = arith.addf %17, %19 : vector<200x32xf32>
    %cst_15 = arith.constant 5.000000e-01 : f32
    %21 = vector.broadcast %cst_15 : f32 to vector<200x32xf32>
    %22 = arith.mulf %21, %20 : vector<200x32xf32>
    %23 = math.tanh %22 : vector<200x32xf32>
    %cst_16 = arith.constant 5.000000e-01 : f32
    %24 = vector.broadcast %cst_16 : f32 to vector<200x32xf32>
    %25 = arith.mulf %24, %23 : vector<200x32xf32>
    %cst_17 = arith.constant 5.000000e-01 : f32
    %26 = vector.broadcast %cst_17 : f32 to vector<200x32xf32>
    %27 = arith.addf %25, %26 : vector<200x32xf32>
    %c0_18 = arith.constant 0 : index
    %c0_19 = arith.constant 0 : index
    %28 = vector.load %arg7[%c0_18, %c0_19] : memref<200x32xf32, #tpu.memory_space<vmem>>, vector<200x32xf32>
    tpu.vector_store %arg7[%c0_18, %c0_19], %27 {strides = array<i32>} : memref<200x32xf32, #tpu.memory_space<vmem>>, vector<200x32xf32>,
    return
  }
  func.func @transform_0(%arg0: i32) -> (i32, i32) {
    %c0_i32 = arith.constant 0 : i32
    %c0_i32_0 = arith.constant 0 : i32
    return %arg0, %c0_i32 : i32, i32
  }
  func.func @transform_1(%arg0: i32) -> (i32, i32) {
    %c0_i32 = arith.constant 0 : i32
    %c0_i32_0 = arith.constant 0 : i32
    %c0_i32_1 = arith.constant 0 : i32
    return %c0_i32, %c0_i32_0 : i32, i32
  }
  func.func @transform_2(%arg0: i32) -> (i32, i32) {
    %c0_i32 = arith.constant 0 : i32
    %c0_i32_0 = arith.constant 0 : i32
    %c0_i32_1 = arith.constant 0 : i32
    return %c0_i32, %c0_i32_0 : i32, i32
  }
  func.func @transform_3(%arg0: i32) -> (i32, i32) {
    %c0_i32 = arith.constant 0 : i32
    %c0_i32_0 = arith.constant 0 : i32
    %c0_i32_1 = arith.constant 0 : i32
    return %c0_i32, %c0_i32_0 : i32, i32
  }
  func.func @transform_4(%arg0: i32) -> (i32, i32) {
    %c0_i32 = arith.constant 0 : i32
    %c0_i32_0 = arith.constant 0 : i32
    %c0_i32_1 = arith.constant 0 : i32
    return %c0_i32, %c0_i32_0 : i32, i32
  }
  func.func @transform_5(%arg0: i32) -> (i32, i32) {
    %c0_i32 = arith.constant 0 : i32
    %c0_i32_0 = arith.constant 0 : i32
    return %arg0, %c0_i32 : i32, i32
  }
  func.func @transform_6(%arg0: i32) -> (i32, i32) {
    %c0_i32 = arith.constant 0 : i32
    %c0_i32_0 = arith.constant 0 : i32
    return %arg0, %c0_i32 : i32, i32
  }
}

</mosaic_0001>

<bundles_post_ra>
// kernel: tpu_custom_call.1
= control target key start
LH: loop header
LB: loop body
LE: loop exit
PB: predicated region body
PF: predicated region fallthrough
CT: control target
= control target key end

     0   :  { %v997_v0 = vmov 0.0   ;;  %vm998_vm0 = vmmov 0   ;;  %vm84_vm1 = vcmask 261120   ;;  %vm360_vm2 = vcmask 130048   ;;  %s1459_s1 = inlined_call_operand.vmem [shape: bf16[32,16], index: 1, kind: input, shape index: {}]   ;;  %s1460_s0 = inlined_call_operand.vmem [shape: f32[200,32], index: 0, kind: input, shape index: {}]   ;;  %s1461_s3 = inlined_call_operand.vmem [shape: bf16[16,32], index: 3, kind: input, shape index: {}]   ;;  %s1462_s2 = inlined_call_operand.vmem [shape: f32[1,16], index: 2, kind: input, shape index: {}]   ;;  %s1463_s5 = inlined_call_operand.vmem [shape: f32[200,16], index: 5, kind: output, shape index: {0}]   ;;  %s1464_s4 = inlined_call_operand.vmem [shape: f32[1,32], index: 4, kind: input, shape index: {}]   ;;  %s1465_s6 = inlined_call_operand.vmem [shape: f32[200,32], index: 6, kind: output, shape index: {1}]  }
   0x1   :  { %782 = vmatprep.subr.bf16.mxu0 %v997_v0  ;;  %v894_v1 = vld [vmem:[%s1459_s1 + $0x8] sm:$0xff]   ;;  %786 = vmatprep.mubr.msk.bf16.mxu0 %vm998_vm0, %v997_v0  ;;  %v895_v2 = vld [vmem:[%s1459_s1] sm:$0xff]   ;;  %v25_v6 = vld [vmem:[%s1460_s0 + $0x10] sm:$0xff] }
   0x2   :  { %838 = vmatprep.subr.bf16.mxu1 %v997_v0  ;;  %840 = vmatprep.mubr.msk.bf16.mxu1 %vm998_vm0, %v997_v0  ;;  %v23_v3 = vld [vmem:[%s1460_s0] sm:$0xff]  ;;  %v24_v4 = vld [vmem:[%s1460_s0 + $0x8] sm:$0xff]  ;;  %v26_v7 = vld [vmem:[%s1460_s0 + $0x18] sm:$0xff] }
   0x3   :  { %783 = vmatpush3.bf16.msra.mxu0 %v894_v1  ;;  %v48_v5 = vpack.c.bf16 %v24_v4, %v23_v3  ;;  %v49_v8 = vpack.c.bf16 %v26_v7, %v25_v6  ;;  %v27_v9 = vld [vmem:[%s1460_s0 + $0x20] sm:$0xff]  ;;  %v28_v10 = vld [vmem:[%s1460_s0 + $0x28] sm:$0xff]  ;;  %v29_v12 = vld [vmem:[%s1460_s0 + $0x30] sm:$0xff] }
   0x4   :  { %784 = vmatprep.subr.bf16.mxu0 %v997_v0  ;;  %v50_v11 = vpack.c.bf16 %v28_v10, %v27_v9  ;;  %v30_v13 = vld [vmem:[%s1460_s0 + $0x38] sm:$0xff]  ;;  %v31_v15 = vld [vmem:[%s1460_s0 + $0x40] sm:$0xff]  ;;  %v32_v16 = vld [vmem:[%s1460_s0 + $0x48] sm:$0xff] }
   0x5   :  { %v51_v14 = vpack.c.bf16 %v30_v13, %v29_v12  ;;  %v52_v17 = vpack.c.bf16 %v32_v16, %v31_v15  ;;  %v33_v18 = vld [vmem:[%s1460_s0 + $0x50] sm:$0xff]  ;;  %v34_v19 = vld [vmem:[%s1460_s0 + $0x58] sm:$0xff]  ;;  %v35_v21 = vld [vmem:[%s1460_s0 + $0x60] sm:$0xff] }
   0x6   :  { %v53_v20 = vpack.c.bf16 %v34_v19, %v33_v18  ;;  %v36_v22 = vld [vmem:[%s1460_s0 + $0x68] sm:$0xff]  ;;  %v37_v24 = vld [vmem:[%s1460_s0 + $0x70] sm:$0xff]  ;;  %v38_v25 = vld [vmem:[%s1460_s0 + $0x78] sm:$0xff] }
   0x7   :  { %785 = vmatpush3.bf16.msra.mxu0 %v895_v2  ;;  %v54_v23 = vpack.c.bf16 %v36_v22, %v35_v21  ;;  %v55_v26 = vpack.c.bf16 %v38_v25, %v37_v24  ;;  %v39_v27 = vld [vmem:[%s1460_s0 + $0x80] sm:$0xff]  ;;  %v40_v28 = vld [vmem:[%s1460_s0 + $0x88] sm:$0xff]  ;;  %v41_v30 = vld [vmem:[%s1460_s0 + $0x90] sm:$0xff] }
   0x8   :  { %v56_v29 = vpack.c.bf16 %v40_v28, %v39_v27  ;;  %v42_v31 = vld [vmem:[%s1460_s0 + $0x98] sm:$0xff]  ;;  %v43_v33 = vld [vmem:[%s1460_s0 + $0xa0] sm:$0xff]  ;;  %v44_v34 = vld [vmem:[%s1460_s0 + $0xa8] sm:$0xff] }
   0x9   :  { %v57_v32 = vpack.c.bf16 %v42_v31, %v41_v30  ;;  %v58_v35 = vpack.c.bf16 %v44_v34, %v43_v33  ;;  %v45_v36 = vld [vmem:[%s1460_s0 + $0xb0] sm:$0xff]  ;;  %v46_v37 = vld [vmem:[%s1460_s0 + $0xb8] sm:$0xff]  ;;  %v896_v39 = vld [vmem:[%s1461_s3] sm:$0xff]  }
   0xa   :  { %787 = vmatmul.mubr.msk.bf16.vlgmr.msra.gmra.mxu0 %vm84_vm1, %v48_v5  ;;  %v59_v38 = vpack.c.bf16 %v46_v37, %v45_v36  ;;  %v47_v40 = vld [vmem:[%s1460_s0 + $0xc0] sm:$0xff]  ;;  %839 = vmatpush3.bf16.msra.mxu1 %v896_v39 }
   0xb   :  { %790 = vmatprep.mubr.msk.bf16.mxu0 %vm998_vm0, %v997_v0  ;;  %v60_v41 = vpack.c.bf16 %v47_v40, %v47_v40  ;;  %v1165_v42 = vld [vmem:[%s1462_s2] ss:$0 sm:$0xff] }
  0x12   :  { %791 = vmatmul.mubr.msk.bf16.gmra.mxu0 %vm84_vm1, %v49_v8 }
  0x13   :  { %794 = vmatprep.mubr.msk.bf16.mxu0 %vm998_vm0, %v997_v0 }
  0x1a   :  { %795 = vmatmul.mubr.msk.bf16.gmra.mxu0 %vm84_vm1, %v50_v11 }
  0x1b   :  { %798 = vmatprep.mubr.msk.bf16.mxu0 %vm998_vm0, %v997_v0 }
  0x22   :  { %799 = vmatmul.mubr.msk.bf16.gmra.mxu0 %vm84_vm1, %v51_v14 }
  0x23   :  { %802 = vmatprep.mubr.msk.bf16.mxu0 %vm998_vm0, %v997_v0 }
  0x2a   :  { %803 = vmatmul.mubr.msk.bf16.gmra.mxu0 %vm84_vm1, %v52_v17 }
  0x2b   :  { %806 = vmatprep.mubr.msk.bf16.mxu0 %vm998_vm0, %v997_v0 }
  0x32   :  { %807 = vmatmul.mubr.msk.bf16.gmra.mxu0 %vm84_vm1, %v53_v20 }
  0x33   :  { %810 = vmatprep.mubr.msk.bf16.mxu0 %vm998_vm0, %v997_v0 }
  0x3a   :  { %811 = vmatmul.mubr.msk.bf16.gmra.mxu0 %vm84_vm1, %v54_v23 }
  0x3b   :  { %814 = vmatprep.mubr.msk.bf16.mxu0 %vm998_vm0, %v997_v0 }
  0x42   :  { %815 = vmatmul.mubr.msk.bf16.gmra.mxu0 %vm84_vm1, %v55_v26 }
  0x43   :  { %818 = vmatprep.mubr.msk.bf16.mxu0 %vm998_vm0, %v997_v0 }
  0x4a   :  { %819 = vmatmul.mubr.msk.bf16.gmra.mxu0 %vm84_vm1, %v56_v29 }
  0x4b   :  { %822 = vmatprep.mubr.msk.bf16.mxu0 %vm998_vm0, %v997_v0 }
  0x52   :  { %823 = vmatmul.mubr.msk.bf16.gmra.mxu0 %vm84_vm1, %v57_v32 }
  0x53   :  { %826 = vmatprep.mubr.msk.bf16.mxu0 %vm998_vm0, %v997_v0 }
  0x5a   :  { %827 = vmatmul.mubr.msk.bf16.gmra.mxu0 %vm84_vm1, %v58_v35 }
  0x5b   :  { %830 = vmatprep.mubr.msk.bf16.mxu0 %vm998_vm0, %v997_v0 }
  0x62   :  { %831 = vmatmul.mubr.msk.bf16.gmra.mxu0 %vm84_vm1, %v59_v38 }
  0x63   :  { %834 = vmatprep.mubr.msk.bf16.mxu0 %vm998_vm0, %v997_v0 }
  0x6a   :  { %835 = vmatmul.mubr.msk.bf16.gmra.mxu0 %vm84_vm1, %v60_v41 }
  0xca   :  { %v158_v43 = vpop.f32.mrf.mxu0 }
  0xcb   :  { %v159_v44 = vadd.f32 %v1165_v42, %v158_v43 }
  0xcc   :  { %v788_v45 = vpop.f32.mrf.mxu0 }
  0xcd   :  { %v260_v46 = vmul.f32 0.5, %v159_v44 }
  0xce   :  { %v161_v47 = vpop.f32.mrf.mxu0 }
  0xcf   :  { %897 = vtanh.f32 %v260_v46  ;;  %v162_v48 = vadd.f32 %v1165_v42, %v161_v47 }
  0xd0   :  { %v789_v49 = vpop.f32.mrf.mxu0 }
  0xd1   :  { %v261_v50 = vmul.f32 0.5, %v162_v48 }
  0xd2   :  { %v166_v51 = vpop.f32.mrf.mxu0 }
  0xd3   :  { %899 = vtanh.f32 %v261_v50  ;;  %v167_v52 = vadd.f32 %v1165_v42, %v166_v51 }
  0xd4   :  { %v792_v53 = vpop.f32.mrf.mxu0 }
  0xd5   :  { %v262_v54 = vmul.f32 0.5, %v167_v52 }
  0xd6   :  { %v169_v55 = vpop.f32.mrf.mxu0 }
  0xd7   :  { %901 = vtanh.f32 %v262_v54  ;;  %v170_v56 = vadd.f32 %v1165_v42, %v169_v55 }
  0xd8   :  { %v793_v57 = vpop.f32.mrf.mxu0 }
  0xd9   :  { %v263_v58 = vmul.f32 0.5, %v170_v56 }
  0xda   :  { %v174_v59 = vpop.f32.mrf.mxu0 }
  0xdb   :  { %903 = vtanh.f32 %v263_v58  ;;  %v175_v60 = vadd.f32 %v1165_v42, %v174_v59 }
  0xdc   :  { %v898_v61 = vpop.eup %897  ;;  %v796_v62 = vpop.f32.mrf.mxu0 }
  0xdd   :  { %v310_v63 = vmul.f32 0.5, %v898_v61  ;;  %v264_v1 = vmul.f32 0.5, %v175_v60 }
  0xde   :  { %v177_v2 = vpop.f32.mrf.mxu0 }
  0xdf   :  { %v335_v3 = vadd.f32 0.5, %v310_v63  ;;  %905 = vtanh.f32 %v264_v1  ;;  %v178_v4 = vadd.f32 %v1165_v42, %v177_v2 }
  0xe0   :  { %v900_v5 = vpop.eup %899  ;;  %v797_v6 = vpop.f32.mrf.mxu0 }
  0xe1   :  { %361 = vst.msk [vmem:[%s1463_s5] sm:$0xff] %vm360_vm2, %v335_v3  ;;  %v311_v7 = vmul.f32 0.5, %v900_v5  ;;  %v265_v8 = vmul.f32 0.5, %v178_v4 }
  0xe2   :  { %v182_v9 = vpop.f32.mrf.mxu0 }
  0xe3   :  { %v336_v10 = vadd.f32 0.5, %v311_v7  ;;  %907 = vtanh.f32 %v265_v8  ;;  %v183_v11 = vadd.f32 %v1165_v42, %v182_v9 }
  0xe4   :  { %v902_v12 = vpop.eup %901  ;;  %v800_v13 = vpop.f32.mrf.mxu0 }
  0xe5   :  { %362 = vst.msk [vmem:[%s1463_s5 + $0x8] sm:$0xff] %vm360_vm2, %v336_v10  ;;  %v312_v14 = vmul.f32 0.5, %v902_v12  ;;  %v266_v15 = vmul.f32 0.5, %v183_v11  ;;  %v386_v16 = vpack.c.bf16 %v336_v10, %v335_v3 }
  0xe6   :  { %v185_v17 = vpop.f32.mrf.mxu0 }
  0xe7   :  { %v337_v18 = vadd.f32 0.5, %v312_v14  ;;  %909 = vtanh.f32 %v266_v15  ;;  %v186_v19 = vadd.f32 %v1165_v42, %v185_v17  ;;  %841 = vmatmul.mubr.msk.bf16.vlgmr.msra.gmra.mxu1 %vm360_vm2, %v386_v16 }
  0xe8   :  { %v904_v20 = vpop.eup %903  ;;  %v801_v21 = vpop.f32.mrf.mxu0  ;;  %844 = vmatprep.mubr.msk.bf16.mxu1 %vm998_vm0, %v997_v0 }
  0xe9   :  { %363 = vst.msk [vmem:[%s1463_s5 + $0x10] sm:$0xff] %vm360_vm2, %v337_v18  ;;  %v313_v22 = vmul.f32 0.5, %v904_v20  ;;  %v267_v23 = vmul.f32 0.5, %v186_v19 }
  0xea   :  { %v190_v24 = vpop.f32.mrf.mxu0 }
  0xeb   :  { %v338_v25 = vadd.f32 0.5, %v313_v22  ;;  %911 = vtanh.f32 %v267_v23  ;;  %v191_v26 = vadd.f32 %v1165_v42, %v190_v24 }
  0xec   :  { %v906_v27 = vpop.eup %905  ;;  %v804_v28 = vpop.f32.mrf.mxu0 }
  0xed   :  { %364 = vst.msk [vmem:[%s1463_s5 + $0x18] sm:$0xff] %vm360_vm2, %v338_v25  ;;  %v314_v29 = vmul.f32 0.5, %v906_v27  ;;  %v268_v30 = vmul.f32 0.5, %v191_v26  ;;  %v387_v31 = vpack.c.bf16 %v338_v25, %v337_v18 }
  0xee   :  { %v193_v32 = vpop.f32.mrf.mxu0 }
  0xef   :  { %v339_v33 = vadd.f32 0.5, %v314_v29  ;;  %913 = vtanh.f32 %v268_v30  ;;  %v194_v34 = vadd.f32 %v1165_v42, %v193_v32  ;;  %845 = vmatmul.mubr.msk.bf16.gmra.mxu1 %vm360_vm2, %v387_v31 }
  0xf0   :  { %v908_v35 = vpop.eup %907  ;;  %v805_v36 = vpop.f32.mrf.mxu0  ;;  %848 = vmatprep.mubr.msk.bf16.mxu1 %vm998_vm0, %v997_v0 }
  0xf1   :  { %365 = vst.msk [vmem:[%s1463_s5 + $0x20] sm:$0xff] %vm360_vm2, %v339_v33  ;;  %v315_v37 = vmul.f32 0.5, %v908_v35  ;;  %v269_v38 = vmul.f32 0.5, %v194_v34 }
  0xf2   :  { %v198_v39 = vpop.f32.mrf.mxu0 }
  0xf3   :  { %v340_v40 = vadd.f32 0.5, %v315_v37  ;;  %915 = vtanh.f32 %v269_v38  ;;  %v199_v41 = vadd.f32 %v1165_v42, %v198_v39 }
  0xf4   :  { %v910_v43 = vpop.eup %909  ;;  %v808_v44 = vpop.f32.mrf.mxu0 }
  0xf5   :  { %366 = vst.msk [vmem:[%s1463_s5 + $0x28] sm:$0xff] %vm360_vm2, %v340_v40  ;;  %v316_v45 = vmul.f32 0.5, %v910_v43  ;;  %v270_v46 = vmul.f32 0.5, %v199_v41  ;;  %v388_v47 = vpack.c.bf16 %v340_v40, %v339_v33 }
  0xf6   :  { %v201_v48 = vpop.f32.mrf.mxu0 }
  0xf7   :  { %v341_v49 = vadd.f32 0.5, %v316_v45  ;;  %917 = vtanh.f32 %v270_v46  ;;  %v202_v50 = vadd.f32 %v1165_v42, %v201_v48  ;;  %849 = vmatmul.mubr.msk.bf16.gmra.mxu1 %vm360_vm2, %v388_v47 }
  0xf8   :  { %v912_v51 = vpop.eup %911  ;;  %v809_v52 = vpop.f32.mrf.mxu0  ;;  %852 = vmatprep.mubr.msk.bf16.mxu1 %vm998_vm0, %v997_v0 }
  0xf9   :  { %367 = vst.msk [vmem:[%s1463_s5 + $0x30] sm:$0xff] %vm360_vm2, %v341_v49  ;;  %v317_v53 = vmul.f32 0.5, %v912_v51  ;;  %v271_v54 = vmul.f32 0.5, %v202_v50 }
  0xfa   :  { %v206_v55 = vpop.f32.mrf.mxu0 }
  0xfb   :  { %v342_v56 = vadd.f32 0.5, %v317_v53  ;;  %919 = vtanh.f32 %v271_v54  ;;  %v207_v57 = vadd.f32 %v1165_v42, %v206_v55 }
  0xfc   :  { %v914_v58 = vpop.eup %913  ;;  %v812_v59 = vpop.f32.mrf.mxu0 }
  0xfd   :  { %368 = vst.msk [vmem:[%s1463_s5 + $0x38] sm:$0xff] %vm360_vm2, %v342_v56  ;;  %v318_v60 = vmul.f32 0.5, %v914_v58  ;;  %v272_v61 = vmul.f32 0.5, %v207_v57  ;;  %v389_v62 = vpack.c.bf16 %v342_v56, %v341_v49 }
  0xfe   :  { %v209_v63 = vpop.f32.mrf.mxu0 }
  0xff   :  { %v343_v1 = vadd.f32 0.5, %v318_v60  ;;  %921 = vtanh.f32 %v272_v61  ;;  %v210_v2 = vadd.f32 %v1165_v42, %v209_v63  ;;  %853 = vmatmul.mubr.msk.bf16.gmra.mxu1 %vm360_vm2, %v389_v62 }
 0x100   :  { %v916_v3 = vpop.eup %915  ;;  %v813_v4 = vpop.f32.mrf.mxu0  ;;  %856 = vmatprep.mubr.msk.bf16.mxu1 %vm998_vm0, %v997_v0 }
 0x101   :  { %369 = vst.msk [vmem:[%s1463_s5 + $0x40] sm:$0xff] %vm360_vm2, %v343_v1  ;;  %v319_v5 = vmul.f32 0.5, %v916_v3  ;;  %v273_v6 = vmul.f32 0.5, %v210_v2 }
 0x102   :  { %v214_v7 = vpop.f32.mrf.mxu0 }
 0x103   :  { %v344_v8 = vadd.f32 0.5, %v319_v5  ;;  %923 = vtanh.f32 %v273_v6  ;;  %v215_v9 = vadd.f32 %v1165_v42, %v214_v7 }
 0x104   :  { %v918_v10 = vpop.eup %917  ;;  %v816_v11 = vpop.f32.mrf.mxu0 }
 0x105   :  { %370 = vst.msk [vmem:[%s1463_s5 + $0x48] sm:$0xff] %vm360_vm2, %v344_v8  ;;  %v320_v12 = vmul.f32 0.5, %v918_v10  ;;  %v274_v13 = vmul.f32 0.5, %v215_v9  ;;  %v390_v14 = vpack.c.bf16 %v344_v8, %v343_v1 }
 0x106   :  { %v217_v15 = vpop.f32.mrf.mxu0 }
 0x107   :  { %v345_v16 = vadd.f32 0.5, %v320_v12  ;;  %925 = vtanh.f32 %v274_v13  ;;  %v218_v17 = vadd.f32 %v1165_v42, %v217_v15  ;;  %857 = vmatmul.mubr.msk.bf16.gmra.mxu1 %vm360_vm2, %v390_v14 }
 0x108   :  { %v920_v18 = vpop.eup %919  ;;  %v817_v19 = vpop.f32.mrf.mxu0  ;;  %860 = vmatprep.mubr.msk.bf16.mxu1 %vm998_vm0, %v997_v0 }
 0x109   :  { %371 = vst.msk [vmem:[%s1463_s5 + $0x50] sm:$0xff] %vm360_vm2, %v345_v16  ;;  %v321_v20 = vmul.f32 0.5, %v920_v18  ;;  %v275_v21 = vmul.f32 0.5, %v218_v17 }
 0x10a   :  { %v222_v22 = vpop.f32.mrf.mxu0 }
 0x10b   :  { %v346_v23 = vadd.f32 0.5, %v321_v20  ;;  %927 = vtanh.f32 %v275_v21  ;;  %v223_v24 = vadd.f32 %v1165_v42, %v222_v22 }
 0x10c   :  { %v922_v25 = vpop.eup %921  ;;  %v820_v26 = vpop.f32.mrf.mxu0 }
 0x10d   :  { %372 = vst.msk [vmem:[%s1463_s5 + $0x58] sm:$0xff] %vm360_vm2, %v346_v23  ;;  %v322_v27 = vmul.f32 0.5, %v922_v25  ;;  %v276_v28 = vmul.f32 0.5, %v223_v24  ;;  %v391_v29 = vpack.c.bf16 %v346_v23, %v345_v16 }
 0x10e   :  { %v225_v30 = vpop.f32.mrf.mxu0 }
 0x10f   :  { %v347_v31 = vadd.f32 0.5, %v322_v27  ;;  %929 = vtanh.f32 %v276_v28  ;;  %v226_v32 = vadd.f32 %v1165_v42, %v225_v30  ;;  %861 = vmatmul.mubr.msk.bf16.gmra.mxu1 %vm360_vm2, %v391_v29 }
 0x110   :  { %v924_v33 = vpop.eup %923  ;;  %v821_v34 = vpop.f32.mrf.mxu0  ;;  %864 = vmatprep.mubr.msk.bf16.mxu1 %vm998_vm0, %v997_v0 }
 0x111   :  { %373 = vst.msk [vmem:[%s1463_s5 + $0x60] sm:$0xff] %vm360_vm2, %v347_v31  ;;  %v323_v35 = vmul.f32 0.5, %v924_v33  ;;  %v277_v36 = vmul.f32 0.5, %v226_v32 }
 0x112   :  { %v230_v37 = vpop.f32.mrf.mxu0 }
 0x113   :  { %v348_v38 = vadd.f32 0.5, %v323_v35  ;;  %931 = vtanh.f32 %v277_v36  ;;  %v231_v39 = vadd.f32 %v1165_v42, %v230_v37 }
 0x114   :  { %v926_v40 = vpop.eup %925  ;;  %v824_v41 = vpop.f32.mrf.mxu0 }
 0x115   :  { %374 = vst.msk [vmem:[%s1463_s5 + $0x68] sm:$0xff] %vm360_vm2, %v348_v38  ;;  %v324_v43 = vmul.f32 0.5, %v926_v40  ;;  %v278_v44 = vmul.f32 0.5, %v231_v39  ;;  %v392_v45 = vpack.c.bf16 %v348_v38, %v347_v31 }
 0x116   :  { %v233_v46 = vpop.f32.mrf.mxu0 }
 0x117   :  { %v349_v47 = vadd.f32 0.5, %v324_v43  ;;  %933 = vtanh.f32 %v278_v44  ;;  %v234_v48 = vadd.f32 %v1165_v42, %v233_v46  ;;  %865 = vmatmul.mubr.msk.bf16.gmra.mxu1 %vm360_vm2, %v392_v45  ;;  %v1332_v46 = vld [vmem:[%s1464_s4] ss:$0 sm:$0xff] }
 0x118   :  { %v928_v49 = vpop.eup %927  ;;  %v825_v50 = vpop.f32.mrf.mxu0  ;;  %868 = vmatprep.mubr.msk.bf16.mxu1 %vm998_vm0, %v997_v0 }
 0x119   :  { %375 = vst.msk [vmem:[%s1463_s5 + $0x70] sm:$0xff] %vm360_vm2, %v349_v47  ;;  %v325_v51 = vmul.f32 0.5, %v928_v49  ;;  %v279_v52 = vmul.f32 0.5, %v234_v48 }
 0x11a   :  { %v238_v53 = vpop.f32.mrf.mxu0 }
 0x11b   :  { %v350_v54 = vadd.f32 0.5, %v325_v51  ;;  %935 = vtanh.f32 %v279_v52  ;;  %v239_v55 = vadd.f32 %v1165_v42, %v238_v53 }
 0x11c   :  { %v930_v56 = vpop.eup %929  ;;  %v828_v57 = vpop.f32.mrf.mxu0 }
 0x11d   :  { %376 = vst.msk [vmem:[%s1463_s5 + $0x78] sm:$0xff] %vm360_vm2, %v350_v54  ;;  %v326_v58 = vmul.f32 0.5, %v930_v56  ;;  %v280_v59 = vmul.f32 0.5, %v239_v55  ;;  %v393_v60 = vpack.c.bf16 %v350_v54, %v349_v47 }
 0x11e   :  { %v241_v61 = vpop.f32.mrf.mxu0 }
 0x11f   :  { %v351_v62 = vadd.f32 0.5, %v326_v58  ;;  %937 = vtanh.f32 %v280_v59  ;;  %v242_v63 = vadd.f32 %v1165_v42, %v241_v61  ;;  %869 = vmatmul.mubr.msk.bf16.gmra.mxu1 %vm360_vm2, %v393_v60 }
 0x120   :  { %v932_v1 = vpop.eup %931  ;;  %v829_v2 = vpop.f32.mrf.mxu0  ;;  %872 = vmatprep.mubr.msk.bf16.mxu1 %vm998_vm0, %v997_v0 }
 0x121   :  { %377 = vst.msk [vmem:[%s1463_s5 + $0x80] sm:$0xff] %vm360_vm2, %v351_v62  ;;  %v327_v3 = vmul.f32 0.5, %v932_v1  ;;  %v281_v4 = vmul.f32 0.5, %v242_v63 }
 0x122   :  { %v246_v5 = vpop.f32.mrf.mxu0 }
 0x123   :  { %v352_v6 = vadd.f32 0.5, %v327_v3  ;;  %939 = vtanh.f32 %v281_v4  ;;  %v247_v7 = vadd.f32 %v1165_v42, %v246_v5 }
 0x124   :  { %v934_v8 = vpop.eup %933  ;;  %v832_v9 = vpop.f32.mrf.mxu0 }
 0x125   :  { %378 = vst.msk [vmem:[%s1463_s5 + $0x88] sm:$0xff] %vm360_vm2, %v352_v6  ;;  %v328_v10 = vmul.f32 0.5, %v934_v8  ;;  %v282_v11 = vmul.f32 0.5, %v247_v7  ;;  %v394_v12 = vpack.c.bf16 %v352_v6, %v351_v62 }
 0x126   :  { %v249_v13 = vpop.f32.mrf.mxu0 }
 0x127   :  { %v353_v14 = vadd.f32 0.5, %v328_v10  ;;  %941 = vtanh.f32 %v282_v11  ;;  %v250_v15 = vadd.f32 %v1165_v42, %v249_v13  ;;  %873 = vmatmul.mubr.msk.bf16.gmra.mxu1 %vm360_vm2, %v394_v12 }
 0x128   :  { %v936_v16 = vpop.eup %935  ;;  %v833_v17 = vpop.f32.mrf.mxu0  ;;  %876 = vmatprep.mubr.msk.bf16.mxu1 %vm998_vm0, %v997_v0 }
 0x129   :  { %379 = vst.msk [vmem:[%s1463_s5 + $0x90] sm:$0xff] %vm360_vm2, %v353_v14  ;;  %v329_v18 = vmul.f32 0.5, %v936_v16  ;;  %v283_v19 = vmul.f32 0.5, %v250_v15 }
 0x12a   :  { %v254_v20 = vpop.f32.mrf.mxu0 }
 0x12b   :  { %v354_v21 = vadd.f32 0.5, %v329_v18  ;;  %943 = vtanh.f32 %v283_v19  ;;  %v255_v22 = vadd.f32 %v1165_v42, %v254_v20 }
 0x12c   :  { %v938_v23 = vpop.eup %937  ;;  %v836_v24 = vpop.f32.mrf.mxu0 }
 0x12d   :  { %380 = vst.msk [vmem:[%s1463_s5 + $0x98] sm:$0xff] %vm360_vm2, %v354_v21  ;;  %v330_v25 = vmul.f32 0.5, %v938_v23  ;;  %v284_v26 = vmul.f32 0.5, %v255_v22  ;;  %v395_v27 = vpack.c.bf16 %v354_v21, %v353_v14 }
 0x12e   :  { %v257_v28 = vpop.f32.mrf.mxu0 }
 0x12f   :  { %v355_v29 = vadd.f32 0.5, %v330_v25  ;;  %945 = vtanh.f32 %v284_v26  ;;  %877 = vmatmul.mubr.msk.bf16.gmra.mxu1 %vm360_vm2, %v395_v27 }
 0x130   :  { %v940_v30 = vpop.eup %939  ;;  %v837_v31 = vpop.f32.mrf.mxu0  ;;  %880 = vmatprep.mubr.msk.bf16.mxu1 %vm998_vm0, %v997_v0 }
 0x131   :  { %381 = vst.msk [vmem:[%s1463_s5 + $0xa0] sm:$0xff] %vm360_vm2, %v355_v29  ;;  %v331_v42 = vmul.f32 0.5, %v940_v30 }
 0x133   :  { %v356_v32 = vadd.f32 0.5, %v331_v42 }
 0x134   :  { %v942_v33 = vpop.eup %941 }
 0x135   :  { %382 = vst.msk [vmem:[%s1463_s5 + $0xa8] sm:$0xff] %vm360_vm2, %v356_v32  ;;  %v332_v34 = vmul.f32 0.5, %v942_v33  ;;  %v396_v35 = vpack.c.bf16 %v356_v32, %v355_v29 }
 0x137   :  { %v357_v36 = vadd.f32 0.5, %v332_v34  ;;  %881 = vmatmul.mubr.msk.bf16.gmra.mxu1 %vm360_vm2, %v396_v35 }
 0x138   :  { %v944_v37 = vpop.eup %943  ;;  %884 = vmatprep.mubr.msk.bf16.mxu1 %vm998_vm0, %v997_v0 }
 0x139   :  { %383 = vst.msk [vmem:[%s1463_s5 + $0xb0] sm:$0xff] %vm360_vm2, %v357_v36  ;;  %v333_v38 = vmul.f32 0.5, %v944_v37 }
 0x13b   :  { %v358_v39 = vadd.f32 0.5, %v333_v38 }
 0x13c   :  { %v946_v40 = vpop.eup %945 }
 0x13d   :  { %384 = vst.msk [vmem:[%s1463_s5 + $0xb8] sm:$0xff] %vm360_vm2, %v358_v39  ;;  %v334_v41 = vmul.f32 0.5, %v946_v40  ;;  %v397_v43 = vpack.c.bf16 %v358_v39, %v357_v36 }
 0x13f   :  { %v359_v44 = vadd.f32 0.5, %v334_v41  ;;  %885 = vmatmul.mubr.msk.bf16.gmra.mxu1 %vm360_vm2, %v397_v43 }
 0x140   :  { %888 = vmatprep.mubr.msk.bf16.mxu1 %vm998_vm0, %v997_v0 }
 0x141   :  { %385 = vst.msk [vmem:[%s1463_s5 + $0xc0] sm:$0xff] %vm360_vm2, %v359_v44  ;;  %v398_v45 = vpack.c.bf16 %v359_v44, %v359_v44 }
 0x147   :  { %889 = vmatmul.mubr.msk.bf16.gmra.mxu1 %vm360_vm2, %v398_v45 }
 0x1a7   :  { %v487_v47 = vpop.f32.mrf.mxu1 }
 0x1a8   :  { %v488_v48 = vadd.f32 %v1332_v46, %v487_v47 }
 0x1a9   :  { %v842_v49 = vpop.f32.mrf.mxu1 }
 0x1aa   :  { %v589_v50 = vmul.f32 0.5, %v488_v48 }
 0x1ab   :  { %v490_v51 = vpop.f32.mrf.mxu1 }
 0x1ac   :  { %947 = vtanh.f32 %v589_v50  ;;  %v491_v0 = vadd.f32 %v1332_v46, %v490_v51 }
 0x1ad   :  { %v843_v52 = vpop.f32.mrf.mxu1 }
 0x1ae   :  { %v590_v53 = vmul.f32 0.5, %v491_v0 }
 0x1af   :  { %v495_v54 = vpop.f32.mrf.mxu1 }
 0x1b0   :  { %949 = vtanh.f32 %v590_v53  ;;  %v496_v55 = vadd.f32 %v1332_v46, %v495_v54 }
 0x1b1   :  { %v846_v56 = vpop.f32.mrf.mxu1 }
 0x1b2   :  { %v591_v57 = vmul.f32 0.5, %v496_v55 }
 0x1b3   :  { %v498_v58 = vpop.f32.mrf.mxu1 }
 0x1b4   :  { %951 = vtanh.f32 %v591_v57  ;;  %v499_v59 = vadd.f32 %v1332_v46, %v498_v58 }
 0x1b5   :  { %v847_v60 = vpop.f32.mrf.mxu1 }
 0x1b6   :  { %v592_v61 = vmul.f32 0.5, %v499_v59 }
 0x1b7   :  { %v503_v62 = vpop.f32.mrf.mxu1 }
 0x1b8   :  { %953 = vtanh.f32 %v592_v61  ;;  %v504_v63 = vadd.f32 %v1332_v46, %v503_v62 }
 0x1b9   :  { %v948_v1 = vpop.eup %947  ;;  %v850_v2 = vpop.f32.mrf.mxu1 }
 0x1ba   :  { %v639_v3 = vmul.f32 0.5, %v948_v1  ;;  %v593_v4 = vmul.f32 0.5, %v504_v63 }
 0x1bb   :  { %v506_v5 = vpop.f32.mrf.mxu1 }
 0x1bc   :  { %v664_v6 = vadd.f32 0.5, %v639_v3  ;;  %955 = vtanh.f32 %v593_v4  ;;  %v507_v7 = vadd.f32 %v1332_v46, %v506_v5 }
 0x1bd   :  { %v950_v8 = vpop.eup %949  ;;  %v851_v9 = vpop.f32.mrf.mxu1 }
 0x1be   :  { %689 = vst.msk [vmem:[%s1465_s6] sm:$0xff] %vm84_vm1, %v664_v6  ;;  %v640_v10 = vmul.f32 0.5, %v950_v8  ;;  %v594_v11 = vmul.f32 0.5, %v507_v7 }
 0x1bf   :  { %v511_v12 = vpop.f32.mrf.mxu1 }
 0x1c0   :  { %v665_v13 = vadd.f32 0.5, %v640_v10  ;;  %957 = vtanh.f32 %v594_v11  ;;  %v512_v14 = vadd.f32 %v1332_v46, %v511_v12 }
 0x1c1   :  { %v952_v15 = vpop.eup %951  ;;  %v854_v16 = vpop.f32.mrf.mxu1 }
 0x1c2   :  { %690 = vst.msk [vmem:[%s1465_s6 + $0x8] sm:$0xff] %vm84_vm1, %v665_v13  ;;  %v641_v17 = vmul.f32 0.5, %v952_v15  ;;  %v595_v18 = vmul.f32 0.5, %v512_v14 }
 0x1c3   :  { %v514_v19 = vpop.f32.mrf.mxu1 }
 0x1c4   :  { %v666_v20 = vadd.f32 0.5, %v641_v17  ;;  %959 = vtanh.f32 %v595_v18  ;;  %v515_v21 = vadd.f32 %v1332_v46, %v514_v19 }
 0x1c5   :  { %v954_v22 = vpop.eup %953  ;;  %v855_v23 = vpop.f32.mrf.mxu1 }
 0x1c6   :  { %691 = vst.msk [vmem:[%s1465_s6 + $0x10] sm:$0xff] %vm84_vm1, %v666_v20  ;;  %v642_v24 = vmul.f32 0.5, %v954_v22  ;;  %v596_v25 = vmul.f32 0.5, %v515_v21 }
 0x1c7   :  { %v519_v26 = vpop.f32.mrf.mxu1 }
 0x1c8   :  { %v667_v27 = vadd.f32 0.5, %v642_v24  ;;  %961 = vtanh.f32 %v596_v25  ;;  %v520_v28 = vadd.f32 %v1332_v46, %v519_v26 }
 0x1c9   :  { %v956_v29 = vpop.eup %955  ;;  %v858_v30 = vpop.f32.mrf.mxu1 }
 0x1ca   :  { %692 = vst.msk [vmem:[%s1465_s6 + $0x18] sm:$0xff] %vm84_vm1, %v667_v27  ;;  %v643_v31 = vmul.f32 0.5, %v956_v29  ;;  %v597_v42 = vmul.f32 0.5, %v520_v28 }
 0x1cb   :  { %v522_v32 = vpop.f32.mrf.mxu1 }
 0x1cc   :  { %v668_v33 = vadd.f32 0.5, %v643_v31  ;;  %963 = vtanh.f32 %v597_v42  ;;  %v523_v34 = vadd.f32 %v1332_v46, %v522_v32 }
 0x1cd   :  { %v958_v35 = vpop.eup %957  ;;  %v859_v36 = vpop.f32.mrf.mxu1 }
 0x1ce   :  { %693 = vst.msk [vmem:[%s1465_s6 + $0x20] sm:$0xff] %vm84_vm1, %v668_v33  ;;  %v644_v37 = vmul.f32 0.5, %v958_v35  ;;  %v598_v38 = vmul.f32 0.5, %v523_v34 }
 0x1cf   :  { %v527_v39 = vpop.f32.mrf.mxu1 }
 0x1d0   :  { %v669_v40 = vadd.f32 0.5, %v644_v37  ;;  %965 = vtanh.f32 %v598_v38  ;;  %v528_v41 = vadd.f32 %v1332_v46, %v527_v39 }
 0x1d1   :  { %v960_v43 = vpop.eup %959  ;;  %v862_v44 = vpop.f32.mrf.mxu1 }
 0x1d2   :  { %694 = vst.msk [vmem:[%s1465_s6 + $0x28] sm:$0xff] %vm84_vm1, %v669_v40  ;;  %v645_v45 = vmul.f32 0.5, %v960_v43  ;;  %v599_v47 = vmul.f32 0.5, %v528_v41 }
 0x1d3   :  { %v530_v48 = vpop.f32.mrf.mxu1 }
 0x1d4   :  { %v670_v49 = vadd.f32 0.5, %v645_v45  ;;  %967 = vtanh.f32 %v599_v47  ;;  %v531_v50 = vadd.f32 %v1332_v46, %v530_v48 }
 0x1d5   :  { %v962_v51 = vpop.eup %961  ;;  %v863_v0 = vpop.f32.mrf.mxu1 }
 0x1d6   :  { %695 = vst.msk [vmem:[%s1465_s6 + $0x30] sm:$0xff] %vm84_vm1, %v670_v49  ;;  %v646_v52 = vmul.f32 0.5, %v962_v51  ;;  %v600_v53 = vmul.f32 0.5, %v531_v50 }
 0x1d7   :  { %v535_v54 = vpop.f32.mrf.mxu1 }
 0x1d8   :  { %v671_v55 = vadd.f32 0.5, %v646_v52  ;;  %969 = vtanh.f32 %v600_v53  ;;  %v536_v56 = vadd.f32 %v1332_v46, %v535_v54 }
 0x1d9   :  { %v964_v57 = vpop.eup %963  ;;  %v866_v58 = vpop.f32.mrf.mxu1 }
 0x1da   :  { %696 = vst.msk [vmem:[%s1465_s6 + $0x38] sm:$0xff] %vm84_vm1, %v671_v55  ;;  %v647_v59 = vmul.f32 0.5, %v964_v57  ;;  %v601_v60 = vmul.f32 0.5, %v536_v56 }
 0x1db   :  { %v538_v61 = vpop.f32.mrf.mxu1 }
 0x1dc   :  { %v672_v62 = vadd.f32 0.5, %v647_v59  ;;  %971 = vtanh.f32 %v601_v60  ;;  %v539_v63 = vadd.f32 %v1332_v46, %v538_v61 }
 0x1dd   :  { %v966_v1 = vpop.eup %965  ;;  %v867_v2 = vpop.f32.mrf.mxu1 }
 0x1de   :  { %697 = vst.msk [vmem:[%s1465_s6 + $0x40] sm:$0xff] %vm84_vm1, %v672_v62  ;;  %v648_v3 = vmul.f32 0.5, %v966_v1  ;;  %v602_v4 = vmul.f32 0.5, %v539_v63 }
 0x1df   :  { %v543_v5 = vpop.f32.mrf.mxu1 }
 0x1e0   :  { %v673_v6 = vadd.f32 0.5, %v648_v3  ;;  %973 = vtanh.f32 %v602_v4  ;;  %v544_v7 = vadd.f32 %v1332_v46, %v543_v5 }
 0x1e1   :  { %v968_v8 = vpop.eup %967  ;;  %v870_v9 = vpop.f32.mrf.mxu1 }
 0x1e2   :  { %698 = vst.msk [vmem:[%s1465_s6 + $0x48] sm:$0xff] %vm84_vm1, %v673_v6  ;;  %v649_v10 = vmul.f32 0.5, %v968_v8  ;;  %v603_v11 = vmul.f32 0.5, %v544_v7 }
 0x1e3   :  { %v546_v12 = vpop.f32.mrf.mxu1 }
 0x1e4   :  { %v674_v13 = vadd.f32 0.5, %v649_v10  ;;  %975 = vtanh.f32 %v603_v11  ;;  %v547_v14 = vadd.f32 %v1332_v46, %v546_v12 }
 0x1e5   :  { %v970_v15 = vpop.eup %969  ;;  %v871_v16 = vpop.f32.mrf.mxu1 }
 0x1e6   :  { %699 = vst.msk [vmem:[%s1465_s6 + $0x50] sm:$0xff] %vm84_vm1, %v674_v13  ;;  %v650_v17 = vmul.f32 0.5, %v970_v15  ;;  %v604_v18 = vmul.f32 0.5, %v547_v14 }
 0x1e7   :  { %v551_v19 = vpop.f32.mrf.mxu1 }
 0x1e8   :  { %v675_v20 = vadd.f32 0.5, %v650_v17  ;;  %977 = vtanh.f32 %v604_v18  ;;  %v552_v21 = vadd.f32 %v1332_v46, %v551_v19 }
 0x1e9   :  { %v972_v22 = vpop.eup %971  ;;  %v874_v23 = vpop.f32.mrf.mxu1 }
 0x1ea   :  { %700 = vst.msk [vmem:[%s1465_s6 + $0x58] sm:$0xff] %vm84_vm1, %v675_v20  ;;  %v651_v24 = vmul.f32 0.5, %v972_v22  ;;  %v605_v25 = vmul.f32 0.5, %v552_v21 }
 0x1eb   :  { %v554_v26 = vpop.f32.mrf.mxu1 }
 0x1ec   :  { %v676_v27 = vadd.f32 0.5, %v651_v24  ;;  %979 = vtanh.f32 %v605_v25  ;;  %v555_v28 = vadd.f32 %v1332_v46, %v554_v26 }
 0x1ed   :  { %v974_v29 = vpop.eup %973  ;;  %v875_v30 = vpop.f32.mrf.mxu1 }
 0x1ee   :  { %701 = vst.msk [vmem:[%s1465_s6 + $0x60] sm:$0xff] %vm84_vm1, %v676_v27  ;;  %v652_v31 = vmul.f32 0.5, %v974_v29  ;;  %v606_v42 = vmul.f32 0.5, %v555_v28 }
 0x1ef   :  { %v559_v32 = vpop.f32.mrf.mxu1 }
 0x1f0   :  { %v677_v33 = vadd.f32 0.5, %v652_v31  ;;  %981 = vtanh.f32 %v606_v42  ;;  %v560_v34 = vadd.f32 %v1332_v46, %v559_v32 }
 0x1f1   :  { %v976_v35 = vpop.eup %975  ;;  %v878_v36 = vpop.f32.mrf.mxu1 }
 0x1f2   :  { %702 = vst.msk [vmem:[%s1465_s6 + $0x68] sm:$0xff] %vm84_vm1, %v677_v33  ;;  %v653_v37 = vmul.f32 0.5, %v976_v35  ;;  %v607_v38 = vmul.f32 0.5, %v560_v34 }
 0x1f3   :  { %v562_v39 = vpop.f32.mrf.mxu1 }
 0x1f4   :  { %v678_v40 = vadd.f32 0.5, %v653_v37  ;;  %983 = vtanh.f32 %v607_v38  ;;  %v563_v41 = vadd.f32 %v1332_v46, %v562_v39 }
 0x1f5   :  { %v978_v43 = vpop.eup %977  ;;  %v879_v44 = vpop.f32.mrf.mxu1 }
 0x1f6   :  { %703 = vst.msk [vmem:[%s1465_s6 + $0x70] sm:$0xff] %vm84_vm1, %v678_v40  ;;  %v654_v45 = vmul.f32 0.5, %v978_v43  ;;  %v608_v47 = vmul.f32 0.5, %v563_v41 }
 0x1f7   :  { %v567_v48 = vpop.f32.mrf.mxu1 }
 0x1f8   :  { %v679_v49 = vadd.f32 0.5, %v654_v45  ;;  %985 = vtanh.f32 %v608_v47  ;;  %v568_v50 = vadd.f32 %v1332_v46, %v567_v48 }
 0x1f9   :  { %v980_v51 = vpop.eup %979  ;;  %v882_v0 = vpop.f32.mrf.mxu1 }
 0x1fa   :  { %704 = vst.msk [vmem:[%s1465_s6 + $0x78] sm:$0xff] %vm84_vm1, %v679_v49  ;;  %v655_v52 = vmul.f32 0.5, %v980_v51  ;;  %v609_v53 = vmul.f32 0.5, %v568_v50 }
 0x1fb   :  { %v570_v54 = vpop.f32.mrf.mxu1 }
 0x1fc   :  { %v680_v55 = vadd.f32 0.5, %v655_v52  ;;  %987 = vtanh.f32 %v609_v53  ;;  %v571_v56 = vadd.f32 %v1332_v46, %v570_v54 }
 0x1fd   :  { %v982_v57 = vpop.eup %981  ;;  %v883_v58 = vpop.f32.mrf.mxu1 }
 0x1fe   :  { %705 = vst.msk [vmem:[%s1465_s6 + $0x80] sm:$0xff] %vm84_vm1, %v680_v55  ;;  %v656_v59 = vmul.f32 0.5, %v982_v57  ;;  %v610_v60 = vmul.f32 0.5, %v571_v56 }
 0x1ff   :  { %v575_v61 = vpop.f32.mrf.mxu1 }
 0x200   :  { %v681_v62 = vadd.f32 0.5, %v656_v59  ;;  %989 = vtanh.f32 %v610_v60  ;;  %v576_v63 = vadd.f32 %v1332_v46, %v575_v61 }
 0x201   :  { %v984_v1 = vpop.eup %983  ;;  %v886_v2 = vpop.f32.mrf.mxu1 }
 0x202   :  { %706 = vst.msk [vmem:[%s1465_s6 + $0x88] sm:$0xff] %vm84_vm1, %v681_v62  ;;  %v657_v3 = vmul.f32 0.5, %v984_v1  ;;  %v611_v4 = vmul.f32 0.5, %v576_v63 }
 0x203   :  { %v578_v5 = vpop.f32.mrf.mxu1 }
 0x204   :  { %v682_v6 = vadd.f32 0.5, %v657_v3  ;;  %991 = vtanh.f32 %v611_v4  ;;  %v579_v7 = vadd.f32 %v1332_v46, %v578_v5 }
 0x205   :  { %v986_v8 = vpop.eup %985  ;;  %v887_v9 = vpop.f32.mrf.mxu1 }
 0x206   :  { %707 = vst.msk [vmem:[%s1465_s6 + $0x90] sm:$0xff] %vm84_vm1, %v682_v6  ;;  %v658_v10 = vmul.f32 0.5, %v986_v8  ;;  %v612_v11 = vmul.f32 0.5, %v579_v7 }
 0x207   :  { %v583_v12 = vpop.f32.mrf.mxu1 }
 0x208   :  { %v683_v13 = vadd.f32 0.5, %v658_v10  ;;  %993 = vtanh.f32 %v612_v11  ;;  %v584_v14 = vadd.f32 %v1332_v46, %v583_v12 }
 0x209   :  { %v988_v15 = vpop.eup %987  ;;  %v890_v16 = vpop.f32.mrf.mxu1 }
 0x20a   :  { %708 = vst.msk [vmem:[%s1465_s6 + $0x98] sm:$0xff] %vm84_vm1, %v683_v13  ;;  %v659_v17 = vmul.f32 0.5, %v988_v15  ;;  %v613_v18 = vmul.f32 0.5, %v584_v14 }
 0x20b   :  { %v586_v19 = vpop.f32.mrf.mxu1 }
 0x20c   :  { %v684_v20 = vadd.f32 0.5, %v659_v17  ;;  %995 = vtanh.f32 %v613_v18 }
 0x20d   :  { %v990_v21 = vpop.eup %989  ;;  %v891_v22 = vpop.f32.mrf.mxu1 }
 0x20e   :  { %709 = vst.msk [vmem:[%s1465_s6 + $0xa0] sm:$0xff] %vm84_vm1, %v684_v20  ;;  %v660_v46 = vmul.f32 0.5, %v990_v21 }
 0x210   :  { %v685_v23 = vadd.f32 0.5, %v660_v46 }
 0x211   :  { %v992_v24 = vpop.eup %991 }
 0x212   :  { %710 = vst.msk [vmem:[%s1465_s6 + $0xa8] sm:$0xff] %vm84_vm1, %v685_v23  ;;  %v661_v25 = vmul.f32 0.5, %v992_v24 }
 0x214   :  { %v686_v26 = vadd.f32 0.5, %v661_v25 }
 0x215   :  { %v994_v27 = vpop.eup %993 }
 0x216   :  { %711 = vst.msk [vmem:[%s1465_s6 + $0xb0] sm:$0xff] %vm84_vm1, %v686_v26  ;;  %v662_v28 = vmul.f32 0.5, %v994_v27 }
 0x218   :  { %v687_v29 = vadd.f32 0.5, %v662_v28 }
 0x219   :  { %v996_v30 = vpop.eup %995 }
 0x21a   :  { %712 = vst.msk [vmem:[%s1465_s6 + $0xb8] sm:$0xff] %vm84_vm1, %v687_v29  ;;  %v663_v31 = vmul.f32 0.5, %v996_v30 }
 0x21c   :  { %v688_v42 = vadd.f32 0.5, %v663_v31 }
 0x21e   :  { %713 = vst.msk [vmem:[%s1465_s6 + $0xc0] sm:$0xff] %vm84_vm1, %v688_v42 }

</bundles_post_ra>
